<compile_context>
chip_gen: v7x
topology: tpu7x:2x2x1
jax: 0.10.0
libtpu: 0.0.40
codegen_flags: <defaults>
</compile_context>

<pallas_src>
import jax
import jax.numpy as jnp
from jax import lax
from jax.experimental import pallas as pl
from jax.experimental.pallas import tpu as pltpu


_LANE = 128
_SUBLANE = 8
_MAX_BLOCK_ROWS = 32768
_MIB = 1024 * 1024


def _round_up(x, m):
    return (x + m - 1) // m * m


def _vmem_capacity_bytes():
    """Physical VMEM of the local chip; conservative (v7x-sized) fallback."""
    try:
        info = pltpu.get_tpu_info()
        cap = int(getattr(info, "vmem_capacity_bytes", 0))
        if cap > 0:
            return cap
    except Exception:
        pass
    return 64 * _MIB


def _make_probit_kernel(bf16_dot):
    def kernel(x_ref, w_ref, b_ref, o_ref):
        # x_ref: (TM, D) VMEM  -- streamed row tile (native dtype, lane-masked D)
        # w_ref: (1, D)  VMEM  -- resident weight row (nn.Linear layout)
        # b_ref: (1,)    SMEM  -- scalar bias
        # o_ref: (1, TM) VMEM  -- lane-dense output row for this tile
        xv = x_ref[...]
        wv = w_ref[...]
        if bf16_dot:
            # Opt-in: bf16 operands, f32 accumulate -> fewer MXU passes.
            xv = xv.astype(jnp.bfloat16)
            wv = wv.astype(jnp.bfloat16)
        elif xv.dtype != jnp.float32:
            # bf16 activations: upcast in VMEM (cheap VPU cast, no HBM copy).
            xv = xv.astype(jnp.float32)
        # NT matmul: contract the feature (lane) axis of both operands so the
        # result is produced directly in lane-dense (1, TM) form.
        z = lax.dot_general(
            wv,
            xv,
            dimension_numbers=(((1,), (1,)), ((), ())),
            preferred_element_type=jnp.float32,
        )
        z = z + b_ref[0]
        # standard normal CDF: Phi(z) = 0.5 * (1 + erf(z / sqrt(2)))
        inv_sqrt2 = jnp.float32(0.7071067811865476)
        o_ref[...] = 0.5 * (1.0 + lax.erf(z * inv_sqrt2))

    return kernel


def laplace_probit_forward(x, weight, bias, *, block_rows=None, bf16_dot=False):
    """x: (N, D) f32/bf16, weight: (1, D) or (D,), bias: (1,).

    Returns (N,) f32 = Normal(0, 1).cdf(x @ weight.T + bias).squeeze()
    """
    n, d = x.shape
    # Only the tiny operands get cast in the wrapper; x streams in its native
    # dtype (f32 or bf16) -- no HBM copy of the dominant operand.
    if x.dtype not in (jnp.float32, jnp.bfloat16):
        x = x.astype(jnp.float32)
    weight = jnp.asarray(weight, jnp.float32).reshape(1, d)
    bias = jnp.asarray(bias, jnp.float32).reshape(1)

    x_item = jnp.dtype(x.dtype).itemsize
    d_lanes = _round_up(d, _LANE)  # VMEM footprint is lane-padded

    # Generation-aware streamed-tile size (VMEM-resident bytes, incl. padding).
    vmem_cap = max(_vmem_capacity_bytes(), 48 * _MIB)
    if vmem_cap <= 64 * _MIB:        # v7x: 64 MiB VMEM, 3.2 TB/s HBM
        target_tile_bytes = 14 * _MIB
    else:                            # v5e / v6e: 128 MiB VMEM
        target_tile_bytes = 8 * _MIB

    if block_rows is None:
        tm = target_tile_bytes // (d_lanes * x_item)
        tm = max(_LANE, min(tm, _MAX_BLOCK_ROWS))
        tm = (tm // _LANE) * _LANE           # lane-multiple output rows
    else:
        # Round to a lane multiple so the output slab stores are unmasked.
        tm = max(_LANE, _round_up(block_rows, _LANE))
    tm = min(tm, _round_up(n, _SUBLANE))     # do not overshoot tiny N

    num_tiles = pl.cdiv(n, tm)
    if num_tiles > 1 and num_tiles % 2 == 1:
        # Prefer an even tile count so v7x's two TensorCores split the
        # "parallel" batch axis evenly.
        tm = _round_up(pl.cdiv(n, num_tiles + 1), _LANE)
        num_tiles = pl.cdiv(n, tm)

    # Explicit scoped-VMEM limit: 2 double-buffered x tiles + weight/output
    # + slack; always within physical VMEM on every generation.
    tile_vmem_bytes = tm * d_lanes * x_item
    vmem_limit = int(
        min(max(2 * tile_vmem_bytes + 8 * _MIB, 16 * _MIB), vmem_cap - 16 * _MIB)
    )

    cost = pl.CostEstimate(
        flops=2 * n * d,
        transcendentals=n,
        bytes_accessed=n * d * x_item + 4 * (n + d + 1),
    )

    out = pl.pallas_call(
        _make_probit_kernel(bf16_dot),
        out_shape=jax.ShapeDtypeStruct((num_tiles, tm), jnp.float32),
        grid_spec=pltpu.PrefetchScalarGridSpec(
            num_scalar_prefetch=0,
            grid=(num_tiles,),
            in_specs=[
                # x: streamed (TM, D) row tiles; last block dim == full D
                # (ragged lanes masked by Mosaic), double-buffered by Pallas.
                pl.BlockSpec((tm, d), lambda i: (i, 0)),
                # weight: constant block index -> fetched once, VMEM-resident.
                pl.BlockSpec((1, d), lambda i: (0, 0)),
                # bias: scalar in SMEM.
                pl.BlockSpec(memory_space=pltpu.SMEM),
            ],
            # Lane-dense output slab: one (1, TM) row per grid step.
            out_specs=pl.BlockSpec((1, tm), lambda i: (i, 0)),
        ),
        compiler_params=pltpu.CompilerParams(
            # v7x shards row tiles across its 2 TensorCores; neutral on
            # single-TC v5e/v6e.
            dimension_semantics=("parallel",),
            vmem_limit_bytes=vmem_limit,
        ),
        cost_estimate=cost,
    )(x, weight, bias)

    # (num_tiles, TM) slab -> (N,); rows past N (padded last tile) are dropped.
    # NOTE: keep this slice -- out-of-bounds rows hold garbage by design.
    return out.reshape(-1)[:n]


if __name__ == "__main__":
    key = jax.random.PRNGKey(0)
    kx, kw, kb, kx2 = jax.random.split(key, 4)

    # Small shape consistent with the module: nn.Linear(in_features=32, 1).
    batch, in_features = 8, 32
    x = jax.random.normal(kx, (batch, in_features), dtype=jnp.float32)
    bound = 1.0 / jnp.sqrt(jnp.float32(in_features))
    weight = jax.random.uniform(
        kw, (1, in_features), jnp.float32, minval=-bound, maxval=bound
    )
    bias = jax.random.uniform(kb, (1,), jnp.float32, minval=-bound, maxval=bound)

    y = laplace_probit_forward(x, weight, bias)
    jax.block_until_ready(y)
    ref = jax.scipy.stats.norm.cdf(x @ weight.T + bias).squeeze()
    assert y.shape == (batch,)
    assert jnp.allclose(y, ref, atol=1e-5), (y, ref)

    # Multi-tile path + ragged (non-128-multiple) feature dim, no padding copy.
    batch2, d2 = 400, 96
    x2 = jax.random.normal(kx2, (batch2, d2), dtype=jnp.float32)
    w2 = jax.random.uniform(kw, (1, d2), jnp.float32, minval=-0.2, maxval=0.2)
    y2 = laplace_probit_forward(x2, w2, bias, block_rows=128)
    jax.block_until_ready(y2)
    ref2 = jax.scipy.stats.norm.cdf(x2 @ w2.T + bias).squeeze()
    assert y2.shape == (batch2,)
    assert jnp.allclose(y2, ref2, atol=1e-5), (y2, ref2)

    # bf16 activations: stream at half the HBM bytes, upcast in VMEM.
    x3 = x2.astype(jnp.bfloat16)
    y3 = laplace_probit_forward(x3, w2, bias)
    jax.block_until_ready(y3)
    ref3 = jax.scipy.stats.norm.cdf(
        x3.astype(jnp.float32) @ w2.T + bias
    ).squeeze()
    assert jnp.allclose(y3, ref3, atol=1e-5), (y3, ref3)

    # Opt-in bf16 MXU path (f32 accumulate) -- looser tolerance by design.
    y4 = laplace_probit_forward(x2, w2, bias, bf16_dot=True)
    jax.block_until_ready(y4)
    assert jnp.allclose(y4, ref2, atol=5e-3), (y4, ref2)

    print("KERNEL_OK")
</pallas_src>

<mosaic_0001>
module attributes {stable_mosaic.version = 11 : i64} {
  func.func @kernel(%arg0: i32, %arg1: memref<8x32xf32, #tpu.memory_space<vmem>>, %arg2: memref<1x32xf32, #tpu.memory_space<vmem>>, %arg3: memref<1xf32, #tpu.memory_space<smem>>, %arg4: memref<1x8xf32, #tpu.memory_space<vmem>>) attributes {dimension_semantics = [#tpu.dimension_semantics<parallel>], iteration_bounds = array<i64: 1>, scalar_prefetch = 0 : i64, scratch_operands = 0 : i64, tpu.core_type = #tpu.core_type<tc>, window_params = [{transform_indices = @transform_0, window_bounds = array<i64: 8, 32>}, {pipeline_mode = #tpu.pipeline_mode<synchronous>, transform_indices = @transform_1, window_bounds = array<i64: 1, 32>}, {transform_indices = @transform_2, window_bounds = array<i64: 1>}, {transform_indices = @transform_3, window_bounds = array<i64: 1, 8>}]} {
    %c0 = arith.constant 0 : index
    %c0_0 = arith.constant 0 : index
    %0 = vector.load %arg1[%c0, %c0_0] : memref<8x32xf32, #tpu.memory_space<vmem>>, vector<8x32xf32>
    %c0_1 = arith.constant 0 : index
    %c0_2 = arith.constant 0 : index
    %1 = vector.load %arg2[%c0_1, %c0_2] : memref<1x32xf32, #tpu.memory_space<vmem>>, vector<1x32xf32>
    %cst = arith.constant dense<0.000000e+00> : vector<1x8xf32>
    %2 = tpu.matmul %1, %0, %cst {dimension_numbers = #tpu.dot_dimension_numbers<[1], [1], [0], [0], [0, 0, 1, 0], [], []>} : vector<1x32xf32>, vector<8x32xf32>, vector<1x8xf32> -> vector<1x8xf32>
    %c0_3 = arith.constant 0 : index
    %3 = memref.load %arg3[%c0_3] : memref<1xf32, #tpu.memory_space<smem>>
    %4 = vector.broadcast %3 : f32 to vector<1x8xf32>
    %5 = arith.addf %2, %4 : vector<1x8xf32>
    %cst_4 = arith.constant 0.707106769 : f32
    %6 = vector.broadcast %cst_4 : f32 to vector<1x8xf32>
    %7 = arith.mulf %5, %6 : vector<1x8xf32>
    %8 = math.erf %7 : vector<1x8xf32>
    %cst_5 = arith.constant 1.000000e+00 : f32
    %9 = vector.broadcast %cst_5 : f32 to vector<1x8xf32>
    %10 = arith.addf %9, %8 : vector<1x8xf32>
    %cst_6 = arith.constant 5.000000e-01 : f32
    %11 = vector.broadcast %cst_6 : f32 to vector<1x8xf32>
    %12 = arith.mulf %11, %10 : vector<1x8xf32>
    %c0_7 = arith.constant 0 : index
    %c0_8 = arith.constant 0 : index
    %13 = vector.load %arg4[%c0_7, %c0_8] : memref<1x8xf32, #tpu.memory_space<vmem>>, vector<1x8xf32>
    tpu.vector_store %arg4[%c0_7, %c0_8], %12 {strides = array<i32>} : memref<1x8xf32, #tpu.memory_space<vmem>>, vector<1x8xf32>,
    return
  }
  func.func @transform_0(%arg0: i32) -> (i32, i32) {
    %c0_i32 = arith.constant 0 : i32
    %c0_i32_0 = arith.constant 0 : i32
    return %arg0, %c0_i32 : i32, i32
  }
  func.func @transform_1(%arg0: i32) -> (i32, i32) {
    %c0_i32 = arith.constant 0 : i32
    %c0_i32_0 = arith.constant 0 : i32
    %c0_i32_1 = arith.constant 0 : i32
    return %c0_i32, %c0_i32_0 : i32, i32
  }
  func.func @transform_2(%arg0: i32) -> i32 {
    %c0_i32 = arith.constant 0 : i32
    %c0_i32_0 = arith.constant 0 : i32
    return %c0_i32 : i32
  }
  func.func @transform_3(%arg0: i32) -> (i32, i32) {
    %c0_i32 = arith.constant 0 : i32
    %c0_i32_0 = arith.constant 0 : i32
    return %arg0, %c0_i32 : i32, i32
  }
}

</mosaic_0001>

<bundles_post_ra>
// kernel: tpu_custom_call.1
= control target key start
LH: loop header
LB: loop body
LE: loop exit
PB: predicated region body
PF: predicated region fallthrough
CT: control target
= control target key end

     0   :  { %9 = vsyncpa [#allocation4], 0  ;;  %s247_s0 = inlined_call_operand.hbm [shape: f32[8,32], index: 0, kind: input, shape index: {}]   ;;  %s248_s1 = inlined_call_operand.vmem [shape: f32[1,32], index: 1, kind: input, shape index: {}]   ;;  %s249_s2 = inlined_call_operand.<no memory space> [shape: f32[1], index: 2, kind: input, shape index: {}]   ;;  %s250_s3 = inlined_call_operand.hbm [shape: f32[1,8], index: 3, kind: output, shape index: {}]  }
   0x1   :  { %10 = vsyncpa [#allocation5], 0  ;;  %s193_s12 = smov [#allocation3]   ;;  %s145_s16 = scalar_lea.hbm %s247_s0, 128 }
   0x2   :  { %s17_s13 = sshll.u32 %s193_s12, 4  ;;  %p146_p0 = scmp.ne.s32.totalorder %s247_s0, %s145_s16  ;;  %s18_s13 = int_to_ptr.vmem [resolvable:$true] %s17_s13 }
   0x3   :  { %p149_p1 = scmp.lt.u32.totalorder %s145_s16, %s247_s0 }
   0x5   :  { %p151_p2 = pnand %p149_p1, %p146_p0 }
   0x7   :  { %154 = shalt.err (!%p151_p2)
}
   0x8   :  { %s155_s21 = scalar_lea.vmem %s18_s13, 128  ;;  %p160_p4 = scmp.lt.s32.totalorder %s18_s13, %s18_s13 }
   0x9   :  { %p156_p3 = scmp.ne.s32.totalorder %s18_s13, %s155_s21  ;;  %p161_p5 = scmp.lt.s32.totalorder %s155_s21, %s155_s21 }
   0xb   :  { %p162_p6 = por %p161_p5, %p160_p4 }
   0xd   :  { %p163_p7 = pnand %p162_p6, %p156_p3 }
   0xf   :  { %166 = shalt.err (!%p163_p7)
}
  0x10   :  { %20 = dma.hbm_to_vmem [thread:$0]  %s247_s0, 128, %s18_s13, [#allocation4]  }
  0x11   :  { %189 = dma.done.wait [#allocation4], 128  }
  0x12   :  { %190 = vsyncadd [#allocation4], 4294967168  ;;  %v194_v0 = vmov 0.0   ;;  %vm195_vm0 = vmmov 0   ;;  %vm32_vm1 = vcmask 261120   ;;  %v28_v1 = vld [vmem:[#allocation3] sm:$0xff]  ;;  %v31_v3 = vstv %s249_s2 }
  0x13   :  { %134 = vmatprep.subr.mxu0 %v194_v0  ;;  %136 = vmatprep.mubr.msk.f32.mxu0 %vm195_vm0, %v194_v0  ;;  %v29_v2 = vld [vmem:[%s248_s1] sm:$0x1]  ;;  %s196_s0 = smov [#allocation6]   ;;  %vm113_vm2 = vcmask 57344  }
  0x14   :  { %135 = vmatpush3.xpose.msk.msra.mxu0 %vm32_vm1, %v28_v1  ;;  %s121_s28 = sshll.u32 %s196_s0, 4  ;;  %s122_s28 = int_to_ptr.vmem [resolvable:$true] %s121_s28 }
  0x15   :  { %s167_s29 = scalar_lea.vmem %s122_s28, 16  ;;  %s171_s1 = scalar_lea.vmem %s122_s28, 32 }
  0x16   :  { %p168_p8 = scmp.ne.s32.totalorder %s122_s28, %s167_s29  ;;  %p172_p9 = scmp.lt.s32.totalorder %s122_s28, %s122_s28 }
  0x17   :  { %137 = vmatmul.mubr.msk.f32.vlgmr.msra.gmra.mrb[0].mxu0 %vm32_vm1, %v29_v2  ;;  %p173_p10 = scmp.lt.s32.totalorder %s171_s1, %s167_s29 }
  0x19   :  { %p174_p11 = por %p173_p10, %p172_p9 }
  0x1b   :  { %p175_p12 = pnand %p174_p11, %p168_p8 }
  0xea   :  { %v105_v4 = vpop.f32.mrb[0].mxu0 }
  0xeb   :  { %v106_v5 = vadd.f32 %v105_v4, %v31_v3  ;;  %v138_v6 = vpop.f32.mrb[1].mxu0 }
  0xed   :  { %v109_v7 = vmul.f32 0.70710677, %v106_v5 }
  0xef   :  { %143 = verf.f32 %v109_v7 }
  0xf9   :  { %v144_v8 = vpop.eup %143 }
  0xfa   :  { %v111_v9 = vadd.f32 1.0, %v144_v8 }
  0xfc   :  { %v112_v10 = vmul.f32 0.5, %v111_v9 }
  0xfe   :  { %114 = vst.msk [vmem:[#allocation6] sm:$0x1] %vm113_vm2, %v112_v10 }
  0xff   :  { %178 = shalt.err (!%p175_p12)
}
 0x100   :  { %s179_s4 = scalar_lea.hbm %s250_s3, 16 }
 0x101   :  { %p180_p13 = scmp.ne.s32.totalorder %s250_s3, %s179_s4  ;;  %p183_p0 = scmp.lt.u32.totalorder %s179_s4, %s250_s3 }
 0x103   :  { %p185_p1 = pnand %p183_p0, %p180_p13 }
 0x105   :  { %188 = shalt.err (!%p185_p1)
}
 0x106   :  { %124 = dma.vmem_to_hbm [thread:$0]  %s122_s28, 16, %s250_s3, [#allocation5]  }
 0x107   :  { %191 = dma.done.wait [#allocation5], 16  }
 0x108   :  { %192 = vsyncadd [#allocation5], 4294967280 }
 0x109   :  { %128 = vsyncpa [#allocation4], 1 }
 0x10a   :  { %129 = vsyncpa [#allocation5], 1 }

</bundles_post_ra>
